<compile_context>
chip_gen: v5e
topology: v5e:2x2
jax: 0.10.0
libtpu: 0.0.40
codegen_flags: <defaults>
</compile_context>

<pallas_src>
import jax
import jax.numpy as jnp
from jax.experimental import pallas as pl
from jax.experimental.pallas import tpu as pltpu

LANE = 128  # TPU vreg lane width


def mlp_kernel(x_ref, w1_ref, b1_ref, w2_ref, b2_ref, w3_ref, b3_ref, o_ref):
    # Cast the streamed f32 activation tile to the MXU dtype in-register
    # (avoids a separate HBM pad/cast pass in the wrapper).
    x = x_ref[...].astype(w1_ref.dtype)
    # Hidden layer 1: Linear + ReLU (bf16 MXU matmul, f32 accumulation).
    h = jnp.dot(x, w1_ref[...], preferred_element_type=jnp.float32)
    h = jnp.maximum(h + b1_ref[...], 0.0)
    # Hidden layer 2: Linear + ReLU.
    h = jnp.dot(h.astype(w2_ref.dtype), w2_ref[...],
                preferred_element_type=jnp.float32)
    h = jnp.maximum(h + b2_ref[...], 0.0)
    # Output layer: Linear, no activation. Narrow (out_dim-wide) store.
    out = jnp.dot(h.astype(w3_ref.dtype), w3_ref[...],
                  preferred_element_type=jnp.float32)
    o_ref[...] = (out + b3_ref[...]).astype(o_ref.dtype)


def _round_up(n, m):
    return ((n + m - 1) // m) * m


def _pad2d(a, rows, cols):
    return jnp.pad(a, ((0, rows - a.shape[0]), (0, cols - a.shape[1])))


def _choose_tm(batch, max_tm):
    """Batch tile: multiple of 16 (dense bf16 sublane packing), capped at
    cdiv(batch, 2) so the grid has >= 2 steps when possible (v7x has 2 TCs).
    Tiny batches use a single full-array block (legal for any size)."""
    max_tm = max(16, (max_tm // 16) * 16)
    if batch <= 16:
        return batch
    half = -(-batch // 2)  # cdiv(batch, 2)
    return max(16, min(max_tm, _round_up(half, 16)))


def mlp_forward(x, params, *, compute_dtype=jnp.bfloat16, out_dtype=None,
                max_tm=2048):
    """params: list of (W_pt, b_pt) in PyTorch layout W_pt: [out, in], b_pt: [out].

    Weights are transposed to [in, out], hidden widths zero-padded to 128
    lanes, and cast to `compute_dtype` (all tiny, resident in VMEM). The
    activation x is streamed untouched (f32) and cast inside the kernel; the
    output stays at its true width [batch, out_dim]."""
    (w1, b1), (w2, b2), (w3, b3) = params
    batch, in_dim = x.shape
    out_dim = w3.shape[0]
    out_dtype = x.dtype if out_dtype is None else out_dtype

    h1p = _round_up(w1.shape[0], LANE)   # 64  -> 128
    h2p = _round_up(w2.shape[0], LANE)   # 16  -> 128

    # [in, out] layout, zero-padded hidden widths, bf16 for the MXU.
    # Padding is exact: zero weights/bias contribute 0 and ReLU(0) = 0.
    w1p = _pad2d(w1.T, in_dim, h1p).astype(compute_dtype)
    w2p = _pad2d(w2.T, h1p, h2p).astype(compute_dtype)
    w3p = _pad2d(w3.T, h2p, out_dim).astype(compute_dtype)  # true output width
    b1p = _pad2d(b1[None, :].astype(jnp.float32), 1, h1p)
    b2p = _pad2d(b2[None, :].astype(jnp.float32), 1, h2p)
    b3p = b3[None, :].astype(jnp.float32)

    tm = _choose_tm(batch, max_tm)
    grid = (pl.cdiv(batch, tm),)
    const = lambda i: (0, 0)  # params are resident: same block every step

    flops = 2 * batch * (in_dim * h1p + h1p * h2p + h2p * out_dim)
    bytes_accessed = (
        x.size * x.dtype.itemsize
        + batch * out_dim * jnp.dtype(out_dtype).itemsize
        + sum(a.size * a.dtype.itemsize for a in (w1p, w2p, w3p, b1p, b2p, b3p))
    )

    return pl.pallas_call(
        mlp_kernel,
        out_shape=jax.ShapeDtypeStruct((batch, out_dim), out_dtype),
        grid=grid,
        in_specs=[
            pl.BlockSpec((tm, in_dim), lambda i: (i, 0)),   # streamed activations
            pl.BlockSpec((in_dim, h1p), const),
            pl.BlockSpec((1, h1p), const),
            pl.BlockSpec((h1p, h2p), const),
            pl.BlockSpec((1, h2p), const),
            pl.BlockSpec((h2p, out_dim), const),
            pl.BlockSpec((1, out_dim), const),
        ],
        out_specs=pl.BlockSpec((tm, out_dim), lambda i: (i, 0)),
        compiler_params=pltpu.CompilerParams(
            dimension_semantics=("parallel",),
            vmem_limit_bytes=32 * 1024 * 1024),
        cost_estimate=pl.CostEstimate(
            flops=flops, transcendentals=0, bytes_accessed=bytes_accessed),
    )(x, w1p, b1p, w2p, b2p, w3p, b3p)


def init_params(key, architecture):
    """Deterministic init matching the PyTorch module:
    weight ~ Normal(0, 1) with shape [out, in], bias = zeros([out])."""
    params = []
    for i in range(len(architecture) - 1):
        key, sub = jax.random.split(key)
        fan_in, fan_out = architecture[i], architecture[i + 1]
        w = jax.random.normal(sub, (fan_out, fan_in), dtype=jnp.float32)  # [out, in]
        b = jnp.zeros((fan_out,), dtype=jnp.float32)
        params.append((w, b))
    return params


def mlp_reference(x, params, cast_dtype=None):
    """Pure-JAX reference mirroring the PyTorch forward pass.
    If cast_dtype is given, matmul operands are cast (f32 accumulation) so it
    mirrors the kernel's mixed-precision path."""
    n_layers = len(params)
    h = x
    for i, (w, b) in enumerate(params):
        if cast_dtype is not None:
            h = jnp.dot(h.astype(cast_dtype), w.T.astype(cast_dtype),
                        preferred_element_type=jnp.float32) + b
        else:
            h = h @ w.T + b
        if i < n_layers - 1:
            h = jnp.maximum(h, 0.0)
    return h


if __name__ == "__main__":
    # Small shapes consistent with the module: a multiclass tabular MLP.
    input_features = 8    # X_train.shape[1]
    output_size = 4       # number of unique classes (multiclass task)
    batch = 2
    architecture = [input_features, 64, 16, output_size]

    key = jax.random.PRNGKey(0)
    key, xk = jax.random.split(key)
    x = jax.random.normal(xk, (batch, input_features), dtype=jnp.float32)

    params = init_params(key, architecture)

    out = mlp_forward(x, params)           # bf16 operands, f32 accumulation
    out = jax.block_until_ready(out)

    assert out.shape == (batch, output_size)

    # Tight check against a reference using the same mixed-precision recipe.
    ref_bf16 = mlp_reference(x, params, cast_dtype=jnp.bfloat16)
    assert jnp.allclose(out, ref_bf16, atol=1e-2, rtol=1e-2), "mismatch vs bf16 reference"

    # Loose check against the exact f32 PyTorch-equivalent forward pass
    # (slack is the expected bf16-cast error of N(0,1) weights, fan-in <= 64).
    ref_f32 = mlp_reference(x, params)
    assert jnp.allclose(out, ref_f32, atol=5e-1, rtol=5e-2), "mismatch vs f32 reference"

    print("KERNEL_OK")
</pallas_src>

<mosaic_0001>
module attributes {stable_mosaic.version = 11 : i64} {
  func.func @mlp_kernel(%arg0: i32, %arg1: memref<2x8xf32, #tpu.memory_space<vmem>>, %arg2: memref<8x128xbf16, #tpu.memory_space<vmem>>, %arg3: memref<1x128xf32, #tpu.memory_space<vmem>>, %arg4: memref<128x128xbf16, #tpu.memory_space<vmem>>, %arg5: memref<1x128xf32, #tpu.memory_space<vmem>>, %arg6: memref<128x4xbf16, #tpu.memory_space<vmem>>, %arg7: memref<1x4xf32, #tpu.memory_space<vmem>>, %arg8: memref<2x4xf32, #tpu.memory_space<vmem>>) attributes {dimension_semantics = [#tpu.dimension_semantics<parallel>], iteration_bounds = array<i64: 1>, scalar_prefetch = 0 : i64, scratch_operands = 0 : i64, tpu.core_type = #tpu.core_type<tc>, window_params = [{transform_indices = @transform_0, window_bounds = array<i64: 2, 8>}, {pipeline_mode = #tpu.pipeline_mode<synchronous>, transform_indices = @transform_1, window_bounds = array<i64: 8, 128>}, {pipeline_mode = #tpu.pipeline_mode<synchronous>, transform_indices = @transform_2, window_bounds = array<i64: 1, 128>}, {pipeline_mode = #tpu.pipeline_mode<synchronous>, transform_indices = @transform_3, window_bounds = array<i64: 128, 128>}, {pipeline_mode = #tpu.pipeline_mode<synchronous>, transform_indices = @transform_4, window_bounds = array<i64: 1, 128>}, {pipeline_mode = #tpu.pipeline_mode<synchronous>, transform_indices = @transform_5, window_bounds = array<i64: 128, 4>}, {pipeline_mode = #tpu.pipeline_mode<synchronous>, transform_indices = @transform_6, window_bounds = array<i64: 1, 4>}, {transform_indices = @transform_7, window_bounds = array<i64: 2, 4>}]} {
    %c0 = arith.constant 0 : index
    %c0_0 = arith.constant 0 : index
    %0 = vector.load %arg1[%c0, %c0_0] : memref<2x8xf32, #tpu.memory_space<vmem>>, vector<2x8xf32>
    %1 = arith.truncf %0 : vector<2x8xf32> to vector<2x8xbf16>
    %c0_1 = arith.constant 0 : index
    %c0_2 = arith.constant 0 : index
    %2 = vector.load %arg2[%c0_1, %c0_2] : memref<8x128xbf16, #tpu.memory_space<vmem>>, vector<8x128xbf16>
    %cst = arith.constant dense<0.000000e+00> : vector<2x128xf32>
    %3 = tpu.matmul %1, %2, %cst {dimension_numbers = #tpu.dot_dimension_numbers<[1], [0], [0], [1], [0, 0, 1, 1], [], []>} : vector<2x8xbf16>, vector<8x128xbf16>, vector<2x128xf32> -> vector<2x128xf32>
    %c0_3 = arith.constant 0 : index
    %c0_4 = arith.constant 0 : index
    %4 = vector.load %arg3[%c0_3, %c0_4] : memref<1x128xf32, #tpu.memory_space<vmem>>, vector<1x128xf32>
    %5 = vector.broadcast %4 : vector<1x128xf32> to vector<2x128xf32>
    %6 = arith.addf %3, %5 : vector<2x128xf32>
    %cst_5 = arith.constant 0.000000e+00 : f32
    %7 = vector.broadcast %cst_5 : f32 to vector<2x128xf32>
    %8 = arith.maximumf %6, %7 : vector<2x128xf32>
    %9 = arith.truncf %8 : vector<2x128xf32> to vector<2x128xbf16>
    %c0_6 = arith.constant 0 : index
    %c0_7 = arith.constant 0 : index
    %10 = vector.load %arg4[%c0_6, %c0_7] : memref<128x128xbf16, #tpu.memory_space<vmem>>, vector<128x128xbf16>
    %cst_8 = arith.constant dense<0.000000e+00> : vector<2x128xf32>
    %11 = tpu.matmul %9, %10, %cst_8 {dimension_numbers = #tpu.dot_dimension_numbers<[1], [0], [0], [1], [0, 0, 1, 1], [], []>} : vector<2x128xbf16>, vector<128x128xbf16>, vector<2x128xf32> -> vector<2x128xf32>
    %c0_9 = arith.constant 0 : index
    %c0_10 = arith.constant 0 : index
    %12 = vector.load %arg5[%c0_9, %c0_10] : memref<1x128xf32, #tpu.memory_space<vmem>>, vector<1x128xf32>
    %13 = vector.broadcast %12 : vector<1x128xf32> to vector<2x128xf32>
    %14 = arith.addf %11, %13 : vector<2x128xf32>
    %cst_11 = arith.constant 0.000000e+00 : f32
    %15 = vector.broadcast %cst_11 : f32 to vector<2x128xf32>
    %16 = arith.maximumf %14, %15 : vector<2x128xf32>
    %17 = arith.truncf %16 : vector<2x128xf32> to vector<2x128xbf16>
    %c0_12 = arith.constant 0 : index
    %c0_13 = arith.constant 0 : index
    %18 = vector.load %arg6[%c0_12, %c0_13] : memref<128x4xbf16, #tpu.memory_space<vmem>>, vector<128x4xbf16>
    %cst_14 = arith.constant dense<0.000000e+00> : vector<2x4xf32>
    %19 = tpu.matmul %17, %18, %cst_14 {dimension_numbers = #tpu.dot_dimension_numbers<[1], [0], [0], [1], [0, 0, 1, 1], [], []>} : vector<2x128xbf16>, vector<128x4xbf16>, vector<2x4xf32> -> vector<2x4xf32>
    %c0_15 = arith.constant 0 : index
    %c0_16 = arith.constant 0 : index
    %20 = vector.load %arg7[%c0_15, %c0_16] : memref<1x4xf32, #tpu.memory_space<vmem>>, vector<1x4xf32>
    %21 = vector.broadcast %20 : vector<1x4xf32> to vector<2x4xf32>
    %22 = arith.addf %19, %21 : vector<2x4xf32>
    %c0_17 = arith.constant 0 : index
    %c0_18 = arith.constant 0 : index
    %23 = vector.load %arg8[%c0_17, %c0_18] : memref<2x4xf32, #tpu.memory_space<vmem>>, vector<2x4xf32>
    tpu.vector_store %arg8[%c0_17, %c0_18], %22 {strides = array<i32>} : memref<2x4xf32, #tpu.memory_space<vmem>>, vector<2x4xf32>,
    return
  }
  func.func @transform_0(%arg0: i32) -> (i32, i32) {
    %c0_i32 = arith.constant 0 : i32
    %c0_i32_0 = arith.constant 0 : i32
    return %arg0, %c0_i32 : i32, i32
  }
  func.func @transform_1(%arg0: i32) -> (i32, i32) {
    %c0_i32 = arith.constant 0 : i32
    %c0_i32_0 = arith.constant 0 : i32
    %c0_i32_1 = arith.constant 0 : i32
    return %c0_i32, %c0_i32_0 : i32, i32
  }
  func.func @transform_2(%arg0: i32) -> (i32, i32) {
    %c0_i32 = arith.constant 0 : i32
    %c0_i32_0 = arith.constant 0 : i32
    %c0_i32_1 = arith.constant 0 : i32
    return %c0_i32, %c0_i32_0 : i32, i32
  }
  func.func @transform_3(%arg0: i32) -> (i32, i32) {
    %c0_i32 = arith.constant 0 : i32
    %c0_i32_0 = arith.constant 0 : i32
    %c0_i32_1 = arith.constant 0 : i32
    return %c0_i32, %c0_i32_0 : i32, i32
  }
  func.func @transform_4(%arg0: i32) -> (i32, i32) {
    %c0_i32 = arith.constant 0 : i32
    %c0_i32_0 = arith.constant 0 : i32
    %c0_i32_1 = arith.constant 0 : i32
    return %c0_i32, %c0_i32_0 : i32, i32
  }
  func.func @transform_5(%arg0: i32) -> (i32, i32) {
    %c0_i32 = arith.constant 0 : i32
    %c0_i32_0 = arith.constant 0 : i32
    %c0_i32_1 = arith.constant 0 : i32
    return %c0_i32, %c0_i32_0 : i32, i32
  }
  func.func @transform_6(%arg0: i32) -> (i32, i32) {
    %c0_i32 = arith.constant 0 : i32
    %c0_i32_0 = arith.constant 0 : i32
    %c0_i32_1 = arith.constant 0 : i32
    return %c0_i32, %c0_i32_0 : i32, i32
  }
  func.func @transform_7(%arg0: i32) -> (i32, i32) {
    %c0_i32 = arith.constant 0 : i32
    %c0_i32_0 = arith.constant 0 : i32
    return %arg0, %c0_i32 : i32, i32
  }
}

</mosaic_0001>

<bundles_post_ra>
// kernel: tpu_custom_call.1
= control target key start
LH: loop header
LB: loop body
LE: loop exit
PB: predicated region body
PF: predicated region fallthrough
CT: control target
= control target key end

     0   :  { %12 = vsyncpa [#allocation3], 0  ;;  %s583_s0 = inlined_call_operand.hbm [shape: f32[2,8], index: 0, kind: input, shape index: {}]   ;;  %s584_s1 = inlined_call_operand.vmem [shape: bf16[8,128], index: 1, kind: input, shape index: {}]   ;;  %s585_s2 = inlined_call_operand.hbm [shape: f32[1,128], index: 2, kind: input, shape index: {}]   ;;  %s586_s3 = inlined_call_operand.vmem [shape: bf16[128,128], index: 3, kind: input, shape index: {}]   ;;  %s587_s4 = inlined_call_operand.hbm [shape: f32[1,128], index: 4, kind: input, shape index: {}]   ;;  %s588_s5 = inlined_call_operand.vmem [shape: bf16[128,4], index: 5, kind: input, shape index: {}]   ;;  %s589_s6 = inlined_call_operand.vmem [shape: f32[1,4], index: 6, kind: input, shape index: {}]   ;;  %s590_s7 = inlined_call_operand.hbm [shape: f32[2,4], index: 7, kind: output, shape index: {}]  }
   0x1   :  { %13 = vsyncpa [#allocation6], 0  ;;  %s33_s26 = sshll.u32 %s585_s2, 4  ;;  %s34_s26 = int_to_ptr.hbm [resolvable:$true] %s33_s26 }
   0x2   :  { %14 = vsyncpa [#allocation4], 0  ;;  %s473_s27 = smov [#allocation5]   ;;  %s20_s8 = sshll.u32 %s583_s0, 4  ;;  %s21_s8 = int_to_ptr.hbm [resolvable:$true] %s20_s8 }
   0x3   :  { %s35_s28 = sshll.u32 %s473_s27, 4  ;;  %s474_s9 = smov [#allocation2]   ;;  %s36_s28 = int_to_ptr.vmem [resolvable:$true] %s35_s28 }
   0x4   :  { %38 = dma.hbm_to_vmem [thread:$0]  %s34_s26, 16, %s36_s28, [#allocation6]  }
   0x5   :  { %s22_s10 = sshll.u32 %s474_s9, 4  ;;  %s46_s13 = sshll.u32 %s587_s4, 4  ;;  %s23_s10 = int_to_ptr.vmem [resolvable:$true] %s22_s10  ;;  %s47_s13 = int_to_ptr.hbm [resolvable:$true] %s46_s13 }
   0x6   :  { %25 = dma.hbm_to_vmem [thread:$0]  %s21_s8, 32, %s23_s10, [#allocation3]  }
   0x7   :  { %s475_s2 = smov [#allocation7]  }
   0x8   :  { %s48_s14 = sshll.u32 %s475_s2, 4  ;;  %s49_s14 = int_to_ptr.vmem [resolvable:$true] %s48_s14 }
   0x9   :  { %51 = dma.hbm_to_vmem [thread:$0]  %s47_s13, 16, %s49_s14, [#allocation6]  }
   0xa   :  { %467 = dma.done.wait [#allocation3], 32  }
   0xb   :  { %468 = vsyncadd [#allocation3], 4294967264 }
   0xc   :  { %469 = dma.done.wait [#allocation6], 32  }
   0xd   :  { %470 = vsyncadd [#allocation6], 4294967264  ;;  %vm80_vm0 = vcmask 1043456   ;;  %v71_v0 = vld [vmem:[%s584_s1] sm:$0xf]  ;;  %v355_v2 = vld [vmem:[%s586_s3 + $0x38] sm:$0xff] }
   0xe   :  { %v69_v1 = vld [vmem:[#allocation2] sm:$0x3]  ;;  %v82_v3 = vsel %vm80_vm0, %v71_v0, 0  ;;  %vm76_vm1 = vcmask 64512   ;;  %167 = vmatpush.bf16.msra.mxu1 %v355_v2  ;;  %v354_v5 = vld [vmem:[%s586_s3 + $0x30] sm:$0xff]  ;;  %v353_v6 = vld [vmem:[%s586_s3 + $0x28] sm:$0xff] }
   0xf   :  { %v70_v4 = vpack.c.bf16 %v69_v1, %v69_v1  ;;  %91 = vmatpush.bf16.msra.mxu0 %v82_v3  ;;  %v352_v7 = vld [vmem:[%s586_s3 + $0x20] sm:$0xff]  ;;  %v351_v8 = vld [vmem:[%s586_s3 + $0x18] sm:$0xff]  ;;  %v350_v9 = vld [vmem:[%s586_s3 + $0x10] sm:$0xff]  ;;  %s476_s1 = smov [#allocation8]   ;;  %s272_s24 = sshll.u32 %s590_s7, 4  ;;  %vm263_vm2 = vcmask 25600   ;;  %s273_s24 = int_to_ptr.hbm [resolvable:$true] %s272_s24 }
  0x10   :  { %v349_v10 = vld [vmem:[%s586_s3 + $0x8] sm:$0xff]  ;;  %v348_v11 = vld [vmem:[%s586_s3] sm:$0xff]  ;;  %v363_v12 = vld [vmem:[%s588_s5 + $0x38] sm:$0xff]  ;;  %s270_s21 = sshll.u32 %s476_s1, 4  ;;  %s271_s21 = int_to_ptr.vmem [resolvable:$true] %s270_s21 }
  0x11   :  { %250 = vmatpush.bf16.msra.mxu2 %v363_v12  ;;  %v362_v13 = vld [vmem:[%s588_s5 + $0x30] sm:$0xff]  ;;  %v361_v14 = vld [vmem:[%s588_s5 + $0x28] sm:$0xff]  ;;  %v360_v15 = vld [vmem:[%s588_s5 + $0x20] sm:$0xff] }
  0x12   :  { %283 = vmatmul.msk.bf16.vlgmr.msra.gmra.mxu0 %vm76_vm1, %v70_v4  ;;  %168 = vmatpush.bf16.msra.mxu1 %v354_v5  ;;  %v359_v16 = vld [vmem:[%s588_s5 + $0x18] sm:$0xff]  ;;  %v358_v17 = vld [vmem:[%s588_s5 + $0x10] sm:$0xff]  ;;  %v368_v18 = vld [vmem:[#allocation5] ss:$0 sm:$0xff] }
  0x13   :  { %v357_v24 = vld [vmem:[%s588_s5 + $0x8] sm:$0xff]  ;;  %v356_v25 = vld [vmem:[%s588_s5] sm:$0xff] }
  0x14   :  { %v369_v26 = vld [vmem:[#allocation7] ss:$0 sm:$0xff]  ;;  %v370_v32 = vld [vmem:[%s589_s6] ss:$0 sm:$0xff] }
  0x15   :  { %251 = vmatpush.bf16.msra.mxu2 %v362_v13 }
  0x16   :  { %169 = vmatpush.bf16.msra.mxu1 %v353_v6 }
  0x19   :  { %252 = vmatpush.bf16.msra.mxu2 %v361_v14 }
  0x1a   :  { %170 = vmatpush.bf16.msra.mxu1 %v352_v7 }
  0x1d   :  { %253 = vmatpush.bf16.msra.mxu2 %v360_v15 }
  0x1e   :  { %171 = vmatpush.bf16.msra.mxu1 %v351_v8 }
  0x21   :  { %254 = vmatpush.bf16.msra.mxu2 %v359_v16 }
  0x22   :  { %172 = vmatpush.bf16.msra.mxu1 %v350_v9 }
  0x25   :  { %255 = vmatpush.bf16.msra.mxu2 %v358_v17 }
  0x26   :  { %173 = vmatpush.bf16.msra.mxu1 %v349_v10 }
  0x29   :  { %256 = vmatpush.bf16.msra.mxu2 %v357_v24 }
  0x2a   :  { %174 = vmatpush.bf16.msra.mxu1 %v348_v11 }
  0x2d   :  { %257 = vmatpush.bf16.msra.mxu2 %v356_v25 }
  0x8f   :  { %v93_v19 = vpop.f32.mrf.mxu0 }
  0x90   :  { %v94_v20 = vadd.f32 %v368_v18, %v93_v19 }
  0x92   :  { %v97_v21 = vmax.f32 %v94_v20, 0.0 }
  0x94   :  { %v98_v22 = vpack.c.bf16 %v97_v21, %v97_v21 }
  0x96   :  { %175 = vmatmul.bf16.vlgmr.msra.gmra.mxu1 %v98_v22 }
  0x97   :  { %v95_v23 = vpop.f32.mrf.mxu0 }
 0x113   :  { %v176_v27 = vpop.f32.mrf.mxu1 }
 0x114   :  { %v177_v28 = vadd.f32 %v369_v26, %v176_v27 }
 0x116   :  { %v180_v29 = vmax.f32 %v177_v28, 0.0 }
 0x118   :  { %v181_v30 = vpack.c.bf16 %v180_v29, %v180_v29 }
 0x11a   :  { %258 = vmatmul.bf16.vlgmr.msra.gmra.mxu2 %v181_v30 }
 0x11b   :  { %v178_v31 = vpop.f32.mrf.mxu1 }
 0x19d   :  { %v259_v33 = vpop.f32.mrf.mxu2 }
 0x19e   :  { %v260_v34 = vadd.f32 %v370_v32, %v259_v33 }
 0x1a0   :  { %264 = vst.msk [vmem:[#allocation8] sm:$0x3] %vm263_vm2, %v260_v34 }
 0x1a1   :  { %275 = dma.vmem_to_hbm [thread:$0]  %s271_s21, 32, %s273_s24, [#allocation4]  }
 0x1a5   :  { %v261_v35 = vpop.f32.mrf.mxu2 }
 0x1a6   :  { %471 = dma.done.wait [#allocation4], 32  }
 0x1a7   :  { %472 = vsyncadd [#allocation4], 4294967264 }
 0x1a8   :  { %280 = vsyncpa [#allocation3], 1 }
 0x1a9   :  { %281 = vsyncpa [#allocation6], 1 }
 0x1aa   :  { %282 = vsyncpa [#allocation4], 1 }

</bundles_post_ra>
